<compile_context>
chip_gen: v7x
topology: tpu7x:2x2x1
jax: 0.10.0
libtpu: 0.0.40
codegen_flags: <defaults>
</compile_context>

<pallas_src>
import numpy as np
import jax
import jax.numpy as jnp
from jax.experimental import pallas as pl
from jax.experimental.pallas import tpu as pltpu


def _round_up(v, m):
    return -(-v // m) * m


# ----------------------------------------------------------------------------
# host-side constants (numpy, float64)
# ----------------------------------------------------------------------------
def _calculate_weight_np(k, a, res, truncation):
    """Same as HsLoss_2.calculate_weight."""
    kv = np.concatenate([np.arange(0, res // 2), np.arange(-(res // 2), 0)]).astype(np.float64)
    k_x = np.tile(kv.reshape(res, 1), (1, res))
    k_y = np.tile(kv.reshape(1, res), (res, 1))
    if truncation:
        k_x = np.abs(k_x) * (np.abs(k_x) < 20)
        k_y = np.abs(k_y) * (np.abs(k_y) < 20)
    else:
        k_x, k_y = np.abs(k_x), np.abs(k_y)
    w = np.ones((res, res), dtype=np.float64)
    if k >= 1:
        w = w + a[0] ** 2 * (k_x ** 2 + k_y ** 2)
    if k >= 2:
        w = w + a[1] ** 2 * (k_x ** 4 + 2 * k_x ** 2 * k_y ** 2 + k_y ** 4)
    return np.sqrt(w)  # (res, res)


def _gram_np(k, a, res, truncation, nf):
    """kron(I_nf, G), G = Fw Fw^T with Fw the wsum-weighted ortho-DFT (real form).

    PyTorch broadcast quirk reproduced on purpose: (B,res,res,1)*(res,res)
    indexes the weight as w[v, c], so only wsum[v] = sum_c w[v,c]^2 enters the
    Frobenius norm, and the (unitary) DFT along the first fft axis drops out by
    Parseval.  ||diag(sqrt(wsum)) F row||^2 == row G row^T exactly.
    """
    w = _calculate_weight_np(k, a, res, truncation)                    # (res, res)
    wsum = np.sum(w ** 2, axis=1)                                      # (res,)
    idx = np.arange(res)
    ang = -2.0 * np.pi * np.outer(idx, idx) / res
    sw = np.sqrt(wsum).reshape(1, res) / np.sqrt(res)
    fw = np.concatenate([np.cos(ang) * sw, np.sin(ang) * sw], axis=1)  # (res, 2*res)
    g = fw @ fw.T                                                      # (res, res) symmetric
    return np.kron(np.eye(nf), g)                                      # (nf*res, nf*res)


# ----------------------------------------------------------------------------
# Pallas kernel: one Gram matmul + sublane reduce per (batch-block, row-group)
# ----------------------------------------------------------------------------
def _hs_kernel(z_ref, gram_ref, out_ref):
    # z_ref    : (F, 2*tb) f32. Columns: [diff of tb examples | y of tb examples];
    #            rows: the nf flattened image rows of the current row-group.
    # gram_ref : (F, F) block-diagonal Gram matrix of the weighted ortho DFT.
    # out_ref  : (1, 2*tb) f32 accumulator, resident across the row-group axis.
    @pl.when(pl.program_id(1) == 0)
    def _():
        out_ref[...] = jnp.zeros_like(out_ref)

    z = z_ref[...]
    t = jnp.dot(gram_ref[...], z, preferred_element_type=jnp.float32)  # (F, 2*tb)
    # quadratic form per column: sublane reduction -> lane-dense (1, 2*tb) row
    out_ref[...] += jnp.sum(t * z, axis=0, keepdims=True)


# ----------------------------------------------------------------------------
# wrapper reproducing HsLoss_2.forward
# ----------------------------------------------------------------------------
def hs_loss_2(x, y, *, d=2, p=2, k=1, a=None, size_average=True, reduction=True,
              truncation=True, res=16, relative=True):
    assert p == 2, "only p=2 (L2) norms implemented"
    if a is None:
        a = [1] * k

    B = x.shape[0]
    xv = jnp.reshape(x, (B, res, res, -1))
    yv = jnp.reshape(y, (B, res, res, -1))
    C = xv.shape[-1]
    assert C == 1  # TODO(synk): C > 1 trailing channel not implemented.
    x2 = jnp.reshape(xv, (B, res * res)).astype(jnp.float32)
    y2 = jnp.reshape(yv, (B, res * res)).astype(jnp.float32)

    # ---- fold nf image rows per column so the contraction dim F = nf*res ~ 256
    nf = 1
    for cand in range(1, min(res, max(1, 256 // res)) + 1):
        if res % cand == 0:
            nf = cand
    rg = res // nf
    F = nf * res

    # ---- batch tiling -------------------------------------------------------
    # tb multiple of 64 -> output lane width 2*tb is a multiple of 128 (dense
    # stores).  >= 4 batch blocks for B >= 256 (two pipelined steps per v7x
    # TensorCore); fewer blocks for small B (v5e/v6e are single-core: extra
    # blocks are a serial loop with ~0.35us/step overhead).
    if B >= 256:
        target_blocks = 4
    elif B >= 128:
        target_blocks = 2
    else:
        target_blocks = 1
    tb = max(64, _round_up(-(-B // target_blocks), 64))

    # Cap tb from the full live set: Z block x2 (double buffer) + t + t*z
    # intermediates (~4 block-sized slabs) + Gram x2.  12 MiB budget fits every
    # generation's scoped VMEM (v5e 16 MiB default, v7x 32 MiB / 64 MiB phys).
    gram_bytes = F * F * 4
    max_tb = max(64, ((((12 << 20) - 2 * gram_bytes) // (32 * F)) // 64) * 64)
    tb = min(tb, max_tb)
    num_blocks = -(-B // tb)
    bp = num_blocks * tb

    # ---- constants & lane-major data layout ---------------------------------
    gram = jnp.asarray(_gram_np(k, a, res, truncation, nf), dtype=jnp.float32)

    # diff is computed once in the wrapper and fused into the (already needed)
    # layout transform; the kernel then has a single data input.
    d2 = jnp.pad(x2 - y2, ((0, bp - B), (0, 0)))
    y2p = jnp.pad(y2, ((0, bp - B), (0, 0)))
    d4 = d2.reshape(num_blocks, tb, rg, F)
    y4 = y2p.reshape(num_blocks, tb, rg, F)
    z5 = jnp.stack([d4, y4], axis=1)                            # (nb, 2, tb, rg, F)
    # -> (rg, F, nb*2*tb): features on sublanes, (block, half, example) on lanes.
    z = jnp.transpose(z5, (3, 4, 0, 1, 2)).reshape(rg, F, num_blocks * 2 * tb)

    z_block_bytes = F * 2 * tb * 4
    live_est = 4 * z_block_bytes + 2 * gram_bytes + 2 * (2 * tb * 4)
    vmem_limit = int(min(28 << 20, max(16 << 20, 4 * live_est)))

    out = pl.pallas_call(
        _hs_kernel,
        out_shape=jax.ShapeDtypeStruct((1, num_blocks * 2 * tb), jnp.float32),
        grid_spec=pltpu.PrefetchScalarGridSpec(
            num_scalar_prefetch=0,
            grid=(num_blocks, rg),                              # rowgroup axis innermost
            in_specs=[
                pl.BlockSpec((None, F, 2 * tb), lambda b, g: (g, 0, b)),   # Z slab
                pl.BlockSpec((F, F), lambda b, g: (0, 0)),                 # Gram (const)
            ],
            out_specs=pl.BlockSpec((1, 2 * tb), lambda b, g: (0, b)),
        ),
        compiler_params=pltpu.CompilerParams(
            dimension_semantics=("parallel", "arbitrary"),
            vmem_limit_bytes=vmem_limit),
    )(z, gram)

    out3 = out.reshape(num_blocks, 2, tb)
    # Slice to the real batch BEFORE the divide: padded examples have y_norm = 0.
    diff_norms = jnp.sqrt(out3[:, 0, :].reshape(-1)[:B])
    y_norms = jnp.sqrt(out3[:, 1, :].reshape(-1)[:B])

    if relative:
        ratios = diff_norms / y_norms
        if reduction:
            return jnp.mean(ratios) if size_average else jnp.sum(ratios)
        return ratios
    else:
        # abs(): x_weighted.size(1) == res  ->  h = 1 / (res - 1)
        h = 1.0 / (res - 1.0)
        all_norms = (h ** (d / p)) * diff_norms
        if reduction:
            return jnp.mean(all_norms) if size_average else jnp.sum(all_norms)
        return all_norms


# ----------------------------------------------------------------------------
# pure numpy reference (mirrors the PyTorch forward) for verification
# ----------------------------------------------------------------------------
def reference_loss(x, y, *, k=1, a=None, res=16, truncation=True):
    if a is None:
        a = [1] * k
    xn = np.asarray(x, dtype=np.float64)
    yn = np.asarray(y, dtype=np.float64)
    B = xn.shape[0]
    xv = xn.reshape(B, res, res, -1)
    yv = yn.reshape(B, res, res, -1)
    w = _calculate_weight_np(k, a, res, truncation)
    xf = np.fft.fftn(xv, axes=(1, 2), norm="ortho")
    yf = np.fft.fftn(yv, axes=(1, 2), norm="ortho")
    xw = xf * w          # broadcast (B,res,res,1)*(res,res) -> (B,res,res,res)
    yw = yf * w
    dn = np.linalg.norm((xw - yw).reshape(B, -1), ord=2, axis=1)
    ynorm = np.linalg.norm(yw.reshape(B, -1), ord=2, axis=1)
    return float(np.mean(dn / ynorm))


if __name__ == "__main__":
    key = jax.random.PRNGKey(0)
    k1, k2 = jax.random.split(key)

    # Case 1: res=16, B=256 -> 4 "parallel" batch blocks of tb=64, rg=1.
    res = 16
    B = 256
    x = jax.random.normal(k1, (B, res, res), dtype=jnp.float32)
    y = jax.random.normal(k2, (B, res, res), dtype=jnp.float32)
    loss = jax.block_until_ready(hs_loss_2(x, y, res=res))
    ref = reference_loss(np.asarray(x), np.asarray(y), res=res)
    assert abs(float(loss) - ref) <= 2e-3 * abs(ref) + 1e-5, (float(loss), ref)

    # Case 2: tiny batch (zero-padding path, B=2 padded to one block of 64).
    xs, ys = x[:2], y[:2]
    loss_s = jax.block_until_ready(hs_loss_2(xs, ys, res=res))
    ref_s = reference_loss(np.asarray(xs), np.asarray(ys), res=res)
    assert abs(float(loss_s) - ref_s) <= 2e-3 * abs(ref_s) + 1e-5, (float(loss_s), ref_s)

    # Case 3: res=32, B=8 -> exercises the row-group "arbitrary" reduction axis
    # (rg=4) with accumulation into the resident output block.
    res2 = 32
    k3, k4 = jax.random.split(k2)
    xb = jax.random.normal(k3, (8, res2, res2), dtype=jnp.float32)
    yb = jax.random.normal(k4, (8, res2, res2), dtype=jnp.float32)
    loss2 = jax.block_until_ready(hs_loss_2(xb, yb, res=res2))
    ref2 = reference_loss(np.asarray(xb), np.asarray(yb), res=res2)
    assert abs(float(loss2) - ref2) <= 2e-3 * abs(ref2) + 1e-5, (float(loss2), ref2)

    print("KERNEL_OK")
</pallas_src>

<mosaic_0001>
module attributes {stable_mosaic.version = 11 : i64} {
  func.func @_hs_kernel(%arg0: i32, %arg1: i32, %arg2: memref<1x256x128xf32, #tpu.memory_space<vmem>>, %arg3: memref<256x256xf32, #tpu.memory_space<vmem>>, %arg4: memref<1x128xf32, #tpu.memory_space<vmem>>) attributes {dimension_semantics = [#tpu.dimension_semantics<parallel>, #tpu.dimension_semantics<arbitrary>], iteration_bounds = array<i64: 4, 1>, scalar_prefetch = 0 : i64, scratch_operands = 0 : i64, tpu.core_type = #tpu.core_type<tc>, window_params = [{transform_indices = @transform_0, window_bounds = array<i64: 1, 256, 128>}, {pipeline_mode = #tpu.pipeline_mode<synchronous>, transform_indices = @transform_1, window_bounds = array<i64: 256, 256>}, {transform_indices = @transform_2, window_bounds = array<i64: 1, 128>}]} {
    %c0_i32 = arith.constant 0 : i32
    %0 = arith.cmpi eq, %arg1, %c0_i32 : i32
    %1 = arith.extui %0 : i1 to i32
    %c0_i32_0 = arith.constant 0 : i32
    %2 = arith.cmpi ne, %1, %c0_i32_0 : i32
    scf.if %2 {
      %cst_10 = arith.constant 0.000000e+00 : f32
      %13 = vector.broadcast %cst_10 : f32 to vector<1x128xf32>
      %c0_11 = arith.constant 0 : index
      %c0_12 = arith.constant 0 : index
      %14 = vector.load %arg4[%c0_11, %c0_12] : memref<1x128xf32, #tpu.memory_space<vmem>>, vector<1x128xf32>
      tpu.vector_store %arg4[%c0_11, %c0_12], %13 {strides = array<i32>} : memref<1x128xf32, #tpu.memory_space<vmem>>, vector<1x128xf32>,
    } else {
    }
    %c0 = arith.constant 0 : index
    %c0_1 = arith.constant 0 : index
    %c0_2 = arith.constant 0 : index
    %3 = vector.load %arg2[%c0, %c0_1, %c0_2] : memref<1x256x128xf32, #tpu.memory_space<vmem>>, vector<1x256x128xf32>
    %4 = vector.shape_cast %3 : vector<1x256x128xf32> to vector<256x128xf32>
    %c0_3 = arith.constant 0 : index
    %c0_4 = arith.constant 0 : index
    %5 = vector.load %arg3[%c0_3, %c0_4] : memref<256x256xf32, #tpu.memory_space<vmem>>, vector<256x256xf32>
    %cst = arith.constant dense<0.000000e+00> : vector<256x128xf32>
    %6 = tpu.matmul %5, %4, %cst {dimension_numbers = #tpu.dot_dimension_numbers<[1], [0], [0], [1], [0, 0, 1, 1], [], []>} : vector<256x256xf32>, vector<256x128xf32>, vector<256x128xf32> -> vector<256x128xf32>
    %c0_5 = arith.constant 0 : index
    %c0_6 = arith.constant 0 : index
    %7 = vector.load %arg4[%c0_5, %c0_6] : memref<1x128xf32, #tpu.memory_space<vmem>>, vector<1x128xf32>
    %8 = arith.mulf %6, %4 : vector<256x128xf32>
    %cst_7 = arith.constant dense<0.000000e+00> : vector<128xf32>
    %9 = vector.multi_reduction <add>, %8, %cst_7 [0] : vector<256x128xf32> to vector<128xf32>
    %10 = vector.shape_cast %9 : vector<128xf32> to vector<1x128xf32>
    %11 = arith.addf %7, %10 : vector<1x128xf32>
    %c0_8 = arith.constant 0 : index
    %c0_9 = arith.constant 0 : index
    %12 = vector.load %arg4[%c0_8, %c0_9] : memref<1x128xf32, #tpu.memory_space<vmem>>, vector<1x128xf32>
    tpu.vector_store %arg4[%c0_8, %c0_9], %11 {strides = array<i32>} : memref<1x128xf32, #tpu.memory_space<vmem>>, vector<1x128xf32>,
    return
  }
  func.func @transform_0(%arg0: i32, %arg1: i32) -> (i32, i32, i32) {
    %c0_i32 = arith.constant 0 : i32
    %c0_i32_0 = arith.constant 0 : i32
    return %arg1, %c0_i32, %arg0 : i32, i32, i32
  }
  func.func @transform_1(%arg0: i32, %arg1: i32) -> (i32, i32) {
    %c0_i32 = arith.constant 0 : i32
    %c0_i32_0 = arith.constant 0 : i32
    %c0_i32_1 = arith.constant 0 : i32
    return %c0_i32, %c0_i32_0 : i32, i32
  }
  func.func @transform_2(%arg0: i32, %arg1: i32) -> (i32, i32) {
    %c0_i32 = arith.constant 0 : i32
    %c0_i32_0 = arith.constant 0 : i32
    return %c0_i32, %arg0 : i32, i32
  }
}

</mosaic_0001>

<bundles_post_ra>
// kernel: tpu_custom_call.1
= control target key start
LH: loop header
LB: loop body
LE: loop exit
PB: predicated region body
PF: predicated region fallthrough
CT: control target
= control target key end

     0   :  { %7 = vsyncpa [#allocation3], 0  ;;  %s1466_s0 = inlined_call_operand.hbm [shape: f32[1,256,512], index: 0, kind: input, shape index: {}]   ;;  %s1467_s1 = inlined_call_operand.hbm [shape: f32[256,256], index: 1, kind: input, shape index: {}]   ;;  %s1468_s2 = inlined_call_operand.hbm [shape: f32[1,512], index: 2, kind: output, shape index: {}]  }
   0x1   :  { %9 = vsyncpa [#allocation3 + $0x1], 0 }
   0x2   :  { %10 = vsyncpa [#allocation6], 0 }
   0x3   :  { %11 = vsyncpa [#allocation4], 0 }
   0x4   :  { %13 = vsyncpa [#allocation4 + $0x1], 0  ;;  %s1032_s9 = smov 0   ;;  %s1034_s10 = smov 0  }
   0x5   :  { %s1036_s11 = smov 0   ;;  %s1038_s12 = smov 0  }
   0x6   :  { %s1040_s13 = smov 0   ;;  %s1042_s14 = smov 0  }
   0x7 LB: > { %s688_s15 = sadd.s32 4294967295, %s1005_s14   ;;  %s689_s16 = sadd.s32 4294967294, %s1005_s14   ;;  %s1005_s14 = sphi %s1042_s14, %s19_s14   ;;  %s1001_s13 = sphi %s1040_s13, %s1493_s13   ;;  %s997_s12 = sphi %s1038_s12, %s1492_s12   ;;  %s993_s11 = sphi %s1036_s11, %s1491_s11   ;;  %s989_s10 = sphi %s1034_s10, %s1490_s10   ;;  %s985_s9 = sphi %s1032_s9, %s1489_s9  }
   0x8   : > { %p47_p0 = scmp.ne.s32.totalorder %s993_s11, %s989_s10  ;;  %p48_p1 = scmp.eq.s32.totalorder %s1005_s14, 0 }
   0x9   : > { %p53_p2 = scmp.ne.s32.totalorder %s989_s10, %s985_s9  ;;  %p1069_p3 = scmp.eq.s32.totalorder %s688_s15, 0 }
   0xa   : > { %p1073_p4 = por %p48_p1, %p47_p0  ;;  %p98_p5 = scmp.eq.s32.totalorder %s688_s15, 3 }
   0xb   : > { %s1475_s17 = scalar_select %p1069_p3, 1, 0 }
   0xc   : > { %p1079_p6 = por %p1069_p3, %p53_p2  ;;  %p104_p7 = scmp.eq.s32.totalorder %s689_s16, 3 }
   0xd   : > { %p1083_p8 = por %p98_p5, %p47_p0  ;;  %p690_p9 = scmp.ge.s32.totalorder %s1005_s14, 1 }
   0xe   : > { %s1477_s19 = scalar_select %p1079_p6, 1, 0 }
   0xf   : > { %s1478_s20 = scalar_select %p1083_p8, 1, 0 }
  0x10   : > { %p1088_p10 = por %p104_p7, %p53_p2  ;;  %p111_p11 = scmp.lt.s32.totalorder %s1005_s14, 5 }
  0x11   : > { %s1007_s23 = smov [#allocation5]   ;;  %p802_p0 = scmp.lt.s32.totalorder %s1005_s14, 4 }
  0x12   : > { %s1479_s21 = scalar_select %p1088_p10, 1, 0 }
  0x13   : > { %p1093_p12 = pnand %p690_p9, %p111_p11  ;;  %s123_s24 = sshll.u32 %s1007_s23, 4  ;;  %s124_s24 = int_to_ptr.vmem [resolvable:$true] %s123_s24 }
  0x14   : > { %p1108_p2 = pnand %p802_p0, %p1073_p4  ;;  %s31_s27 = sadd.s32 1, %s1001_s13 }
  0x15   : > { %s1480_s22 = scalar_select %p1093_p12, 1, 0 }
  0x16   : > { %p789_p13 = pneg %p1093_p12  ;;  %s861_s30 = scalar_lea.hbm %s1467_s1, 8192 }
  0x17   : > { %s1482_s26 = scalar_select %p1108_p2, 1, 0 }
  0x18   : > { %p1102_p1 = pnand %p789_p13, %p1069_p3  ;;  %p862_p5 = scmp.ne.s32.totalorder %s1467_s1, %s861_s30 }
  0x19   : > { %p868_p4 = scmp.lt.u32.totalorder %s861_s30, %s1467_s1 }
  0x1a   : > { %p863_p7 = pneg %p1102_p1 }
  0x1c   : > { %p864_p9 = pnand %p863_p7, %p862_p5 }
  0x1e   : > { %p865_p11 = pneg %p864_p9 }
  0x20   : > { %p870_p13 = pnand %p868_p4, %p865_p11 }
  0x22   : > { %873 = shalt.err (!%p870_p13)
}
  0x23   : > { %s874_s7 = scalar_lea.vmem %s124_s24, 8192  ;;  %p882_p3 = scmp.lt.s32.totalorder %s124_s24, %s124_s24 }
  0x24   : > { %p875_p0 = scmp.ne.s32.totalorder %s124_s24, %s874_s7  ;;  %p883_p6 = scmp.lt.s32.totalorder %s874_s7, %s874_s7 }
  0x26   : > { %p877_p10 = pnand %p875_p0, %p863_p7  ;;  %p884_p12 = por %p883_p6, %p882_p3 }
  0x28   : > { %p878_p8 = pneg %p877_p10 }
  0x2a   : > { %p885_p2 = pnand %p884_p12, %p878_p8 }
  0x2c   : > { %888 = shalt.err (!%p885_p2)
}
  0x2d   : > { %s1008_s8 = smov 256   ;;  %s1009_s15 = smov 16  }
  0x2e   : > { %792 = dma.hbm_to_vmem [thread:$0]  (!%p1102_p1), %s1467_s1, 8192, %s124_s24, [#allocation6], %s1008_s8, %s1008_s8, %s1009_s15  }
  0x2f   : > { %p33_p5 = scmp.ge.s32.totalorder %s31_s27, 4  ;;  %s40_s23 = sadd.s32 1, %s993_s11 }
  0x30   : > { %s137_s28 = sand.u32 1, %s993_s11   ;;  %s694_s3 = sshll.u32 %s1001_s13, 7 }
  0x31   : > { %s1495_s27 = smov (%p33_p5, %s31_s27), 0  ;;  %s693_s29 = sshll.u32 %s137_s28, 8 }
  0x32   : > { %s36_s30 = ssub.s32 %s1001_s13, %s1495_s27  ;;  %s1139_s25 = scalar_lea.hbm %s1466_s0, %s694_s3 }
  0x33   : > { %p38_p3 = scmp.eq.s32.totalorder %s36_s30, 0  ;;  %s141_s24 = scalar_lea.vmem [#allocation2], %s693_s29 }
  0x34   : > { %s149_s6 = sshll.u32 %s141_s24, 4  ;;  %s1146_s8 = scalar_lea.sflag [#allocation3], %s137_s28  ;;  %s1144_s6 = int_to_ptr.vmem [resolvable:$true] %s149_s6 }
  0x35   : > { %s1142_s7 = scalar_select %p38_p3, %s993_s11, %s40_s23  }
  0x36   : > { %s889_s15 = scalar_lea.hbm %s1139_s25, 4096  ;;  %p1483_p8 = scmp.ne.s32.totalorder %s1482_s26, 0 }
  0x37   : > { %p890_p6 = scmp.ne.s32.totalorder %s1139_s25, %s889_s15  ;;  %s894_s30 = scalar_lea.hbm %s1466_s0, 16384 }
  0x38   : > { %p891_p10 = pneg %p1483_p8  ;;  %p895_p2 = scmp.lt.u32.totalorder %s1139_s25, %s1466_s0 }
  0x39   : > { %p896_p7 = scmp.lt.u32.totalorder %s894_s30, %s889_s15  ;;  %p898_p11 = scmp.lt.u32.totalorder %s889_s15, %s1139_s25 }
  0x3a   : > { %p892_p12 = pnand %p891_p10, %p890_p6 }
  0x3b   : > { %p897_p9 = por %p896_p7, %p895_p2 }
  0x3c   : > { %p893_p1 = pneg %p892_p12 }
  0x3d   : > { %p899_p4 = por %p898_p11, %p897_p9 }
  0x3f   : > { %p900_p13 = pnand %p899_p4, %p893_p1 }
  0x41   : > { %903 = shalt.err (!%p900_p13)
}
  0x42   : > { %s904_s23 = scalar_lea.vmem %s1144_s6, 4096  ;;  %s1010_s28 = smov [#allocation2]  }
  0x43   : > { %p905_p0 = scmp.ne.s32.totalorder %s1144_s6, %s904_s23  ;;  %s909_s4 = sshll.u32 %s1010_s28, 4  ;;  %s910_s4 = int_to_ptr.vmem [resolvable:$false] %s909_s4 }
  0x44   : > { %s911_s5 = scalar_lea.vmem %s910_s4, 8192  ;;  %p912_p6 = scmp.lt.s32.totalorder %s1144_s6, %s910_s4 }
  0x45   : > { %p907_p5 = pnand %p905_p0, %p891_p10  ;;  %p913_p12 = scmp.lt.s32.totalorder %s911_s5, %s904_s23 }
  0x47   : > { %p908_p3 = pneg %p907_p5  ;;  %p914_p2 = por %p913_p12, %p912_p6 }
  0x49   : > { %p915_p7 = pnand %p914_p2, %p908_p3 }
  0x4b   : > { %918 = shalt.err (!%p915_p7)
}
  0x4c   : > { %s1011_s24 = smov 512   ;;  %s1012_s15 = smov 128  }
  0x4d   : > { %s1013_s16 = smov 8   ;;  %p1484_p10 = scmp.ne.s32.totalorder %s1480_s22, 0 }
  0x4e   : > { %796 = dma.hbm_to_vmem [thread:$0]  (!%p1483_p8), %s1139_s25, 4096, %s1144_s6, %s1146_s8, %s1011_s24, %s1012_s15, %s1013_s16  }
  0x4f   : > { %161 = sbr.rel (%p1484_p10) target bundleno = 492 (0x1ec), region = 28  ;;  %s1177_s18 = sand.u32 (!%p1484_p10), 1, %s989_s10  }
  0x50   : > { %s696_s30 = sshll.u32 (!%p1484_p10), %s1177_s18, 8  ;;  %s164_s29 = scalar_lea.sflag (!%p1484_p10), [#allocation3], %s1177_s18 }
  0x51   : > { %s1181_s3 = scalar_lea.vmem (!%p1484_p10), [#allocation2], %s696_s30  ;;  %p1485_p1 = scmp.ne.s32.totalorder (!%p1484_p10), %s1477_s19, 0 }
  0x56   : > { %972 = dma.done.wait (%p1485_p1), %s164_s29, 4096  }
  0x57   : > { %974 = vsyncadd (%p1485_p1), %s164_s29, 4294963200  ;;  %p1486_p8 = scmp.ne.s32.totalorder %s1475_s17, 0 }
  0x59   : > { %976 = dma.done.wait (%p1486_p8), [#allocation6], 8192  }
  0x5a   : > { %978 = vsyncadd (%p1486_p8), [#allocation6], 4294959104  ;;  %v1014_v0 = vmov 0.0|0.0   ;;  %v1194_v1 = vld [vmem:[%s1181_s3] sm:$0xff]  ;;  %v1197_v2 = vld [vmem:[%s1181_s3 + $0x8] sm:$0xff]  ;;  %s1352_s17 = scalar_lea.vmem [#allocation7], %s1177_s18 }
  0x5b   : > { %701 = vmatprep.subr.bf16.mxu0 %v1014_v0  ;;  %749 = vmatprep.subr.bf16.mxu1 %v1014_v0  ;;  %v1200_v3 = vld [vmem:[%s1181_s3 + $0x10] sm:$0xff]  ;;  %v702_v4 = vpack.c.bf16 %v1197_v2, %v1194_v1  ;;  %v1205_v5 = vld [vmem:[%s1181_s3 + $0x18] sm:$0xff]  ;;  %v1211_v7 = vld [vmem:[%s1181_s3 + $0x20] sm:$0xff]  ;;  %s698_s19 = sshll.u32 %s997_s12, 4  ;;  %s602_s22 = sshll.u32 %s1352_s17, 4  ;;  %s1419_s22 = int_to_ptr.vmem [resolvable:$true] %s602_s22 }
  0x5c   : > { %v705_v6 = vpack.c.bf16 %v1205_v5, %v1200_v3  ;;  %v1214_v8 = vld [vmem:[%s1181_s3 + $0x28] sm:$0xff]  ;;  %v1221_v10 = vld [vmem:[%s1181_s3 + $0x30] sm:$0xff]  ;;  %v1224_v11 = vld [vmem:[%s1181_s3 + $0x38] sm:$0xff]  ;;  %s1417_s6 = scalar_lea.hbm %s1468_s2, %s698_s19  ;;  %s590_s8 = scalar_lea.sflag [#allocation4], %s1177_s18 }
  0x5d   : > { %703 = vmatpush1.bf16.msra.mxu0 %v702_v4  ;;  %765 = vmatpush1.bf16.msra.mxu1 %v702_v4  ;;  %v708_v9 = vpack.c.bf16 %v1214_v8, %v1211_v7  ;;  %v229_v12 = vld [vmem:[#allocation5 + $0x8] sm:$0xff]  ;;  %v711_v13 = vpack.c.bf16 %v1224_v11, %v1221_v10  ;;  %v1231_v14 = vld [vmem:[%s1181_s3 + $0x40] sm:$0xff]  ;;  %v1241_v17 = vld [vmem:[%s1181_s3 + $0x50] sm:$0xff]  ;;  %s919_s23 = scalar_lea.vmem %s1419_s22, 16  ;;  %p1487_p11 = scmp.ne.s32.totalorder %s1478_s20, 0 }
  0x5e   : > { %704 = vmatprep.subr.bf16.mxu0 %v1014_v0  ;;  %750 = vmatprep.subr.bf16.mxu1 %v1014_v0  ;;  %v1234_v15 = vld [vmem:[%s1181_s3 + $0x48] sm:$0xff]  ;;  %v1244_v18 = vld [vmem:[%s1181_s3 + $0x58] sm:$0xff]  ;;  %v1251_v21 = vld [vmem:[%s1181_s3 + $0x60] sm:$0xff]  ;;  %p920_p9 = scmp.ne.s32.totalorder %s1419_s22, %s919_s23  ;;  %s1016_s12 = smov [#allocation7]  }
  0x5f   : > { %356 = vmatprep.mubr.f32.mxu0 %v229_v12  ;;  %v714_v16 = vpack.c.bf16 %v1234_v15, %v1231_v14  ;;  %v261_v19 = vld [vmem:[#allocation5 + $0x108] sm:$0xff]  ;;  %v717_v20 = vpack.c.bf16 %v1244_v18, %v1241_v17  ;;  %v1261_v24 = vld [vmem:[%s1181_s3 + $0x70] sm:$0xff]  ;;  %v1264_v25 = vld [vmem:[%s1181_s3 + $0x78] sm:$0xff]  ;;  %s923_s28 = sshll.u32 %s1016_s12, 4  ;;  %s924_s28 = int_to_ptr.vmem [resolvable:$false] %s923_s28 }
  0x60   : > { %436 = vmatprep.mubr.f32.mxu1 %v261_v19  ;;  %v1254_v22 = vld [vmem:[%s1181_s3 + $0x68] sm:$0xff]  ;;  %v723_v26 = vpack.c.bf16 %v1264_v25, %v1261_v24  ;;  %v1271_v27 = vld [vmem:[%s1181_s3 + $0x80] sm:$0xff]  ;;  %v1281_v30 = vld [vmem:[%s1181_s3 + $0x90] sm:$0xff]  ;;  %p921_p4 = pnand %p920_p9, %p1487_p11  ;;  %s925_s4 = scalar_lea.vmem %s924_s28, 32 }
  0x61   : > { %706 = vmatpush1.bf16.msra.mxu0 %v705_v6  ;;  %766 = vmatpush1.bf16.msra.mxu1 %v705_v6  ;;  %v720_v23 = vpack.c.bf16 %v1254_v22, %v1251_v21  ;;  %v1274_v28 = vld [vmem:[%s1181_s3 + $0x88] sm:$0xff]  ;;  %v1284_v31 = vld [vmem:[%s1181_s3 + $0x98] sm:$0xff]  ;;  %v1291_v33 = vld [vmem:[%s1181_s3 + $0xa0] sm:$0xff]  ;;  %p926_p0 = scmp.lt.s32.totalorder %s1419_s22, %s924_s28  ;;  %p927_p5 = scmp.lt.s32.totalorder %s925_s4, %s919_s23 }
  0x62   : > { %707 = vmatprep.subr.bf16.mxu0 %v1014_v0  ;;  %751 = vmatprep.subr.bf16.mxu1 %v1014_v0  ;;  %v726_v29 = vpack.c.bf16 %v1274_v28, %v1271_v27  ;;  %v729_v32 = vpack.c.bf16 %v1284_v31, %v1281_v30  ;;  %v1294_v34 = vld [vmem:[%s1181_s3 + $0xa8] sm:$0xff]  ;;  %v1301_v36 = vld [vmem:[%s1181_s3 + $0xb0] sm:$0xff]  ;;  %v1304_v37 = vld [vmem:[%s1181_s3 + $0xb8] sm:$0xff]  ;;  %p922_p13 = pneg %p921_p4 }
  0x63   : > { %v732_v35 = vpack.c.bf16 %v1294_v34, %v1291_v33  ;;  %v735_v38 = vpack.c.bf16 %v1304_v37, %v1301_v36  ;;  %v1311_v39 = vld [vmem:[%s1181_s3 + $0xc0] sm:$0xff]  ;;  %v1314_v40 = vld [vmem:[%s1181_s3 + $0xc8] sm:$0xff]  ;;  %v1321_v42 = vld [vmem:[%s1181_s3 + $0xd0] sm:$0xff]  ;;  %p928_p3 = por %p927_p5, %p926_p0 }
  0x64   : > { %v738_v41 = vpack.c.bf16 %v1314_v40, %v1311_v39  ;;  %v1324_v43 = vld [vmem:[%s1181_s3 + $0xd8] sm:$0xff]  ;;  %v1331_v45 = vld [vmem:[%s1181_s3 + $0xe0] sm:$0xff]  ;;  %v1334_v46 = vld [vmem:[%s1181_s3 + $0xe8] sm:$0xff] }
  0x65   : > { %709 = vmatpush1.bf16.msra.mxu0 %v708_v9  ;;  %767 = vmatpush1.bf16.msra.mxu1 %v708_v9  ;;  %v741_v44 = vpack.c.bf16 %v1324_v43, %v1321_v42  ;;  %v744_v47 = vpack.c.bf16 %v1334_v46, %v1331_v45  ;;  %v1341_v48 = vld [vmem:[%s1181_s3 + $0xf0] sm:$0xff]  ;;  %v1344_v49 = vld [vmem:[%s1181_s3 + $0xf8] sm:$0xff]  ;;  %v228_v51 = vld [vmem:[#allocation5] sm:$0xff]  ;;  %p929_p6 = pnand %p928_p3, %p922_p13 }
  0x66   : > { %710 = vmatprep.subr.bf16.mxu0 %v1014_v0  ;;  %752 = vmatprep.subr.bf16.mxu1 %v1014_v0  ;;  %v747_v50 = vpack.c.bf16 %v1344_v49, %v1341_v48  ;;  %v260_v52 = vld [vmem:[#allocation5 + $0x100] sm:$0xff]  ;;  %v231_v53 = vld [vmem:[#allocation5 + $0x18] sm:$0xff]  ;;  %v230_v55 = vld [vmem:[#allocation5 + $0x10] sm:$0xff] }
  0x67   : > { %v263_v54 = vld [vmem:[#allocation5 + $0x118] sm:$0xff]  ;;  %v262_v56 = vld [vmem:[#allocation5 + $0x110] sm:$0xff]  ;;  %v233_v57 = vld [vmem:[#allocation5 + $0x28] sm:$0xff] }
  0x68   : > { %v265_v58 = vld [vmem:[#allocation5 + $0x128] sm:$0xff]  ;;  %v232_v59 = vld [vmem:[#allocation5 + $0x20] sm:$0xff]  ;;  %v235_v61 = vld [vmem:[#allocation5 + $0x38] sm:$0xff] }
  0x69   : > { %712 = vmatpush1.bf16.msra.mxu0 %v711_v13  ;;  %768 = vmatpush1.bf16.msra.mxu1 %v711_v13  ;;  %v264_v60 = vld [vmem:[#allocation5 + $0x120] sm:$0xff]  ;;  %v267_v62 = vld [vmem:[#allocation5 + $0x138] sm:$0xff]  ;;  %v234_v63 = vld [vmem:[#allocation5 + $0x30] sm:$0xff] }
  0x6a   : > { %713 = vmatprep.subr.bf16.mxu0 %v1014_v0  ;;  %753 = vmatprep.subr.bf16.mxu1 %v1014_v0  ;;  %v237_v4 = vld [vmem:[#allocation5 + $0x48] sm:$0xff]  ;;  %v236_v9 = vld [vmem:[#allocation5 + $0x40] sm:$0xff]  ;;  %v239_v13 = vld [vmem:[#allocation5 + $0x58] sm:$0xff] }
  0x6b   : > { %v269_v6 = vld [vmem:[#allocation5 + $0x148] sm:$0xff]  ;;  %v268_v12 = vld [vmem:[#allocation5 + $0x140] sm:$0xff]  ;;  %v238_v19 = vld [vmem:[#allocation5 + $0x50] sm:$0xff] }
  0x6d   : > { %715 = vmatpush1.bf16.msra.mxu0 %v714_v16  ;;  %769 = vmatpush1.bf16.msra.mxu1 %v714_v16  ;;  %v271_v16 = vld [vmem:[#allocation5 + $0x158] sm:$0xff] }
  0x6e   : > { %716 = vmatprep.subr.bf16.mxu0 %v1014_v0  ;;  %754 = vmatprep.subr.bf16.mxu1 %v1014_v0 }
  0x71   : > { %718 = vmatpush1.bf16.msra.mxu0 %v717_v20  ;;  %770 = vmatpush1.bf16.msra.mxu1 %v717_v20  ;;  %v270_v20 = vld [vmem:[#allocation5 + $0x150] sm:$0xff] }
  0x72   : > { %719 = vmatprep.subr.bf16.mxu0 %v1014_v0  ;;  %755 = vmatprep.subr.bf16.mxu1 %v1014_v0 }
  0x75   : > { %721 = vmatpush1.bf16.msra.mxu0 %v720_v23  ;;  %771 = vmatpush1.bf16.msra.mxu1 %v720_v23  ;;  %v241_v23 = vld [vmem:[#allocation5 + $0x68] sm:$0xff] }
  0x76   : > { %722 = vmatprep.subr.bf16.mxu0 %v1014_v0  ;;  %756 = vmatprep.subr.bf16.mxu1 %v1014_v0 }
  0x79   : > { %724 = vmatpush1.bf16.msra.mxu0 %v723_v26  ;;  %772 = vmatpush1.bf16.msra.mxu1 %v723_v26  ;;  %v273_v26 = vld [vmem:[#allocation5 + $0x168] sm:$0xff] }
  0x7a   : > { %725 = vmatprep.subr.bf16.mxu0 %v1014_v0  ;;  %757 = vmatprep.subr.bf16.mxu1 %v1014_v0 }
  0x7d   : > { %727 = vmatpush1.bf16.msra.mxu0 %v726_v29  ;;  %773 = vmatpush1.bf16.msra.mxu1 %v726_v29  ;;  %v240_v29 = vld [vmem:[#allocation5 + $0x60] sm:$0xff] }
  0x7e   : > { %728 = vmatprep.subr.bf16.mxu0 %v1014_v0  ;;  %758 = vmatprep.subr.bf16.mxu1 %v1014_v0 }
  0x81   : > { %730 = vmatpush1.bf16.msra.mxu0 %v729_v32  ;;  %774 = vmatpush1.bf16.msra.mxu1 %v729_v32  ;;  %v272_v32 = vld [vmem:[#allocation5 + $0x160] sm:$0xff] }
  0x82   : > { %731 = vmatprep.subr.bf16.mxu0 %v1014_v0  ;;  %759 = vmatprep.subr.bf16.mxu1 %v1014_v0 }
  0x85   : > { %733 = vmatpush1.bf16.msra.mxu0 %v732_v35  ;;  %775 = vmatpush1.bf16.msra.mxu1 %v732_v35  ;;  %v243_v35 = vld [vmem:[#allocation5 + $0x78] sm:$0xff] }
  0x86   : > { %734 = vmatprep.subr.bf16.mxu0 %v1014_v0  ;;  %760 = vmatprep.subr.bf16.mxu1 %v1014_v0 }
  0x89   : > { %736 = vmatpush1.bf16.msra.mxu0 %v735_v38  ;;  %776 = vmatpush1.bf16.msra.mxu1 %v735_v38  ;;  %v275_v38 = vld [vmem:[#allocation5 + $0x178] sm:$0xff] }
  0x8a   : > { %737 = vmatprep.subr.bf16.mxu0 %v1014_v0  ;;  %761 = vmatprep.subr.bf16.mxu1 %v1014_v0 }
  0x8d   : > { %739 = vmatpush1.bf16.msra.mxu0 %v738_v41  ;;  %777 = vmatpush1.bf16.msra.mxu1 %v738_v41  ;;  %v242_v41 = vld [vmem:[#allocation5 + $0x70] sm:$0xff] }
  0x8e   : > { %740 = vmatprep.subr.bf16.mxu0 %v1014_v0  ;;  %762 = vmatprep.subr.bf16.mxu1 %v1014_v0 }
  0x91   : > { %742 = vmatpush1.bf16.msra.mxu0 %v741_v44  ;;  %778 = vmatpush1.bf16.msra.mxu1 %v741_v44  ;;  %v274_v44 = vld [vmem:[#allocation5 + $0x170] sm:$0xff] }
  0x92   : > { %743 = vmatprep.subr.bf16.mxu0 %v1014_v0  ;;  %763 = vmatprep.subr.bf16.mxu1 %v1014_v0 }
  0x95   : > { %745 = vmatpush1.bf16.msra.mxu0 %v744_v47  ;;  %779 = vmatpush1.bf16.msra.mxu1 %v744_v47  ;;  %v245_v47 = vld [vmem:[#allocation5 + $0x88] sm:$0xff] }
  0x96   : > { %746 = vmatprep.subr.bf16.mxu0 %v1014_v0  ;;  %764 = vmatprep.subr.bf16.mxu1 %v1014_v0  ;;  %v266_v0 = vld [vmem:[#allocation5 + $0x130] sm:$0xff] }
  0x99   : > { %748 = vmatpush1.bf16.msra.mxu0 %v747_v50  ;;  %780 = vmatpush1.bf16.msra.mxu1 %v747_v50  ;;  %v277_v50 = vld [vmem:[#allocation5 + $0x188] sm:$0xff] }
  0x9c   : > { %357 = vmatmul.mubr.f32.vlgmr.msra.gmra.mrb[0].mxu0 %v228_v51  ;;  %437 = vmatmul.mubr.f32.vlgmr.msra.gmra.mrb[0].mxu1 %v260_v52  ;;  %v244_v51 = vld [vmem:[#allocation5 + $0x80] sm:$0xff] }
  0x9d   : > { %361 = vmatprep.mubr.f32.mxu0 %v231_v53  ;;  %441 = vmatprep.mubr.f32.mxu1 %v263_v54  ;;  %v276_v52 = vld [vmem:[#allocation5 + $0x180] sm:$0xff]  ;;  %v247_v53 = vld [vmem:[#allocation5 + $0x98] sm:$0xff] }
  0x9e   : > { %v279_v54 = vld [vmem:[#allocation5 + $0x198] sm:$0xff] }
  0xa0   : > { %362 = vmatmul.mubr.f32.gmra.mrb[2].mxu0 %v230_v55  ;;  %442 = vmatmul.mubr.f32.gmra.mrb[2].mxu1 %v262_v56  ;;  %v246_v55 = vld [vmem:[#allocation5 + $0x90] sm:$0xff] }
  0xa1   : > { %366 = vmatprep.mubr.f32.mxu0 %v233_v57  ;;  %446 = vmatprep.mubr.f32.mxu1 %v265_v58  ;;  %v278_v56 = vld [vmem:[#allocation5 + $0x190] sm:$0xff]  ;;  %v249_v57 = vld [vmem:[#allocation5 + $0xa8] sm:$0xff] }
  0xa2   : > { %v281_v58 = vld [vmem:[#allocation5 + $0x1a8] sm:$0xff] }
  0xa4   : > { %367 = vmatmul.mubr.f32.gmra.mrb[4].mxu0 %v232_v59  ;;  %447 = vmatmul.mubr.f32.gmra.mrb[4].mxu1 %v264_v60  ;;  %v248_v59 = vld [vmem:[#allocation5 + $0xa0] sm:$0xff] }
  0xa5   : > { %371 = vmatprep.mubr.f32.mxu0 %v235_v61  ;;  %451 = vmatprep.mubr.f32.mxu1 %v267_v62  ;;  %v280_v60 = vld [vmem:[#allocation5 + $0x1a0] sm:$0xff]  ;;  %v251_v61 = vld [vmem:[#allocation5 + $0xb8] sm:$0xff] }
  0xa6   : > { %v283_v62 = vld [vmem:[#allocation5 + $0x1b8] sm:$0xff] }
  0xa8   : > { %372 = vmatmul.mubr.f32.gmra.mrb[6].mxu0 %v234_v63  ;;  %452 = vmatmul.mubr.f32.gmra.mrb[6].mxu1 %v266_v0  ;;  %v250_v63 = vld [vmem:[#allocation5 + $0xb0] sm:$0xff] }
  0xa9   : > { %376 = vmatprep.mubr.f32.mxu0 %v237_v4  ;;  %456 = vmatprep.mubr.f32.mxu1 %v269_v6  ;;  %v282_v0 = vld [vmem:[#allocation5 + $0x1b0] sm:$0xff]  ;;  %v253_v4 = vld [vmem:[#allocation5 + $0xc8] sm:$0xff] }
  0xaa   : > { %v285_v6 = vld [vmem:[#allocation5 + $0x1c8] sm:$0xff] }
  0xac   : > { %377 = vmatmul.mubr.f32.gmra.mrb[8].mxu0 %v236_v9  ;;  %457 = vmatmul.mubr.f32.gmra.mrb[8].mxu1 %v268_v12  ;;  %v252_v9 = vld [vmem:[#allocation5 + $0xc0] sm:$0xff] }
  0xad   : > { %381 = vmatprep.mubr.f32.mxu0 %v239_v13  ;;  %461 = vmatprep.mubr.f32.mxu1 %v271_v16  ;;  %v284_v12 = vld [vmem:[#allocation5 + $0x1c0] sm:$0xff]  ;;  %v255_v13 = vld [vmem:[#allocation5 + $0xd8] sm:$0xff] }
  0xae   : > { %v287_v16 = vld [vmem:[#allocation5 + $0x1d8] sm:$0xff] }
  0xb0   : > { %382 = vmatmul.mubr.f32.gmra.mrb[10].mxu0 %v238_v19  ;;  %462 = vmatmul.mubr.f32.gmra.mrb[10].mxu1 %v270_v20  ;;  %v254_v19 = vld [vmem:[#allocation5 + $0xd0] sm:$0xff] }
  0xb1   : > { %386 = vmatprep.mubr.f32.mxu0 %v241_v23  ;;  %466 = vmatprep.mubr.f32.mxu1 %v273_v26  ;;  %v286_v20 = vld [vmem:[#allocation5 + $0x1d0] sm:$0xff]  ;;  %v257_v23 = vld [vmem:[#allocation5 + $0xe8] sm:$0xff] }
  0xb2   : > { %v289_v26 = vld [vmem:[#allocation5 + $0x1e8] sm:$0xff] }
  0xb4   : > { %387 = vmatmul.mubr.f32.gmra.mrb[12].mxu0 %v240_v29  ;;  %467 = vmatmul.mubr.f32.gmra.mrb[12].mxu1 %v272_v32  ;;  %v256_v29 = vld [vmem:[#allocation5 + $0xe0] sm:$0xff] }
  0xb5   : > { %391 = vmatprep.mubr.f32.mxu0 %v243_v35  ;;  %471 = vmatprep.mubr.f32.mxu1 %v275_v38  ;;  %v288_v32 = vld [vmem:[#allocation5 + $0x1e0] sm:$0xff]  ;;  %v259_v35 = vld [vmem:[#allocation5 + $0xf8] sm:$0xff] }
  0xb6   : > { %v291_v38 = vld [vmem:[#allocation5 + $0x1f8] sm:$0xff] }
  0xb8   : > { %392 = vmatmul.mubr.f32.gmra.mrb[14].mxu0 %v242_v41  ;;  %472 = vmatmul.mubr.f32.gmra.mrb[14].mxu1 %v274_v44  ;;  %v258_v41 = vld [vmem:[#allocation5 + $0xf0] sm:$0xff] }
  0xb9   : > { %396 = vmatprep.mubr.f32.mxu0 %v245_v47  ;;  %476 = vmatprep.mubr.f32.mxu1 %v277_v50  ;;  %v290_v44 = vld [vmem:[#allocation5 + $0x1f0] sm:$0xff]  ;;  %v1015_v47 = vmov 0.0  }
  0xba   : > { %195 = vst [vmem:[%s1352_s17] sm:$0x1] %v1015_v47 }
  0xbc   : > { %397 = vmatmul.mubr.f32.gmra.mrb[16].mxu0 %v244_v51  ;;  %477 = vmatmul.mubr.f32.gmra.mrb[16].mxu1 %v276_v52 }
  0xbd   : > { %401 = vmatprep.mubr.f32.mxu0 %v247_v53  ;;  %481 = vmatprep.mubr.f32.mxu1 %v279_v54 }
  0xc0   : > { %402 = vmatmul.mubr.f32.gmra.mrb[18].mxu0 %v246_v55  ;;  %482 = vmatmul.mubr.f32.gmra.mrb[18].mxu1 %v278_v56 }
  0xc1   : > { %406 = vmatprep.mubr.f32.mxu0 %v249_v57  ;;  %486 = vmatprep.mubr.f32.mxu1 %v281_v58 }
  0xc4   : > { %407 = vmatmul.mubr.f32.gmra.mrb[20].mxu0 %v248_v59  ;;  %487 = vmatmul.mubr.f32.gmra.mrb[20].mxu1 %v280_v60 }
  0xc5   : > { %411 = vmatprep.mubr.f32.mxu0 %v251_v61  ;;  %491 = vmatprep.mubr.f32.mxu1 %v283_v62 }
  0xc8   : > { %412 = vmatmul.mubr.f32.gmra.mrb[22].mxu0 %v250_v63  ;;  %492 = vmatmul.mubr.f32.gmra.mrb[22].mxu1 %v282_v0 }
  0xc9   : > { %416 = vmatprep.mubr.f32.mxu0 %v253_v4  ;;  %496 = vmatprep.mubr.f32.mxu1 %v285_v6 }
  0xcc   : > { %417 = vmatmul.mubr.f32.gmra.mrb[24].mxu0 %v252_v9  ;;  %497 = vmatmul.mubr.f32.gmra.mrb[24].mxu1 %v284_v12 }
  0xcd   : > { %421 = vmatprep.mubr.f32.mxu0 %v255_v13  ;;  %501 = vmatprep.mubr.f32.mxu1 %v287_v16 }
  0xd0   : > { %422 = vmatmul.mubr.f32.gmra.mrb[26].mxu0 %v254_v19  ;;  %502 = vmatmul.mubr.f32.gmra.mrb[26].mxu1 %v286_v20 }
  0xd1   : > { %426 = vmatprep.mubr.f32.mxu0 %v257_v23  ;;  %506 = vmatprep.mubr.f32.mxu1 %v289_v26 }
  0xd4   : > { %427 = vmatmul.mubr.f32.gmra.mrb[28].mxu0 %v256_v29  ;;  %507 = vmatmul.mubr.f32.gmra.mrb[28].mxu1 %v288_v32 }
  0xd5   : > { %431 = vmatprep.mubr.f32.mxu0 %v259_v35  ;;  %511 = vmatprep.mubr.f32.mxu1 %v291_v38 }
  0xd8   : > { %432 = vmatmul.mubr.f32.gmra.mrb[30].mxu0 %v258_v41  ;;  %512 = vmatmul.mubr.f32.gmra.mrb[30].mxu1 %v290_v44 }
 0x16f   : > { %v358_v50 = vpop.f32.mrb[0].mxu0  ;;  %v1355_v51 = vpop.f32.mrb[0].mxu1 }
 0x170   : > { %v360_v52 = vpop.f32.mrb[1].mxu0  ;;  %v440_v53 = vpop.f32.mrb[1].mxu1  ;;  %v518_v56 = vmul.f32 %v358_v50, %v1194_v1 }
 0x173   : > { %v363_v54 = vpop.f32.mrb[2].mxu0  ;;  %v1357_v55 = vpop.f32.mrb[2].mxu1 }
 0x174   : > { %v519_v57 = vmul.f32 %v363_v54, %v1197_v2  ;;  %v365_v58 = vpop.f32.mrb[3].mxu0  ;;  %v445_v59 = vpop.f32.mrb[3].mxu1 }
 0x176   : > { %v550_v60 = vadd.f32 %v519_v57, %v518_v56 }
 0x177   : > { %v368_v61 = vpop.f32.mrb[4].mxu0  ;;  %v1361_v62 = vpop.f32.mrb[4].mxu1 }
 0x178   : > { %v520_v63 = vmul.f32 %v368_v61, %v1200_v3  ;;  %v370_v0 = vpop.f32.mrb[5].mxu0  ;;  %v450_v4 = vpop.f32.mrb[5].mxu1 }
 0x17a   : > { %v551_v6 = vadd.f32 %v550_v60, %v520_v63 }
 0x17b   : > { %v373_v9 = vpop.f32.mrb[6].mxu0  ;;  %v1364_v12 = vpop.f32.mrb[6].mxu1 }
 0x17c   : > { %v521_v13 = vmul.f32 %v373_v9, %v1205_v5  ;;  %v375_v16 = vpop.f32.mrb[7].mxu0  ;;  %v455_v1 = vpop.f32.mrb[7].mxu1 }
 0x17e   : > { %v552_v19 = vadd.f32 %v551_v6, %v521_v13 }
 0x17f   : > { %v378_v2 = vpop.f32.mrb[8].mxu0  ;;  %v1367_v20 = vpop.f32.mrb[8].mxu1 }
 0x180   : > { %v522_v23 = vmul.f32 %v378_v2, %v1211_v7  ;;  %v380_v26 = vpop.f32.mrb[9].mxu0  ;;  %v460_v29 = vpop.f32.mrb[9].mxu1 }
 0x182   : > { %v553_v32 = vadd.f32 %v552_v19, %v522_v23 }
 0x183   : > { %v383_v3 = vpop.f32.mrb[10].mxu0  ;;  %v1370_v35 = vpop.f32.mrb[10].mxu1 }
 0x184   : > { %v523_v38 = vmul.f32 %v383_v3, %v1214_v8  ;;  %v385_v41 = vpop.f32.mrb[11].mxu0  ;;  %v465_v44 = vpop.f32.mrb[11].mxu1 }
 0x186   : > { %v554_v47 = vadd.f32 %v553_v32, %v523_v38 }
 0x187   : > { %v388_v5 = vpop.f32.mrb[12].mxu0  ;;  %v1373_v50 = vpop.f32.mrb[12].mxu1 }
 0x188   : > { %v524_v52 = vmul.f32 %v388_v5, %v1221_v10  ;;  %v390_v53 = vpop.f32.mrb[13].mxu0  ;;  %v470_v54 = vpop.f32.mrb[13].mxu1 }
 0x18a   : > { %v555_v56 = vadd.f32 %v554_v47, %v524_v52 }
 0x18b   : > { %v393_v7 = vpop.f32.mrb[14].mxu0  ;;  %v1376_v57 = vpop.f32.mrb[14].mxu1 }
 0x18c   : > { %v525_v58 = vmul.f32 %v393_v7, %v1224_v11  ;;  %v395_v59 = vpop.f32.mrb[15].mxu0  ;;  %v475_v60 = vpop.f32.mrb[15].mxu1 }
 0x18e   : > { %v556_v61 = vadd.f32 %v555_v56, %v525_v58 }
 0x18f   : > { %v398_v8 = vpop.f32.mrb[16].mxu0  ;;  %v478_v63 = vpop.f32.mrb[16].mxu1 }
 0x190   : > { %v526_v0 = vmul.f32 %v398_v8, %v1231_v14  ;;  %v400_v4 = vpop.f32.mrb[17].mxu0  ;;  %v480_v6 = vpop.f32.mrb[17].mxu1 }
 0x192   : > { %v557_v9 = vadd.f32 %v556_v61, %v526_v0 }
 0x193   : > { %v403_v13 = vpop.f32.mrb[18].mxu0  ;;  %v483_v10 = vpop.f32.mrb[18].mxu1 }
 0x194   : > { %v527_v16 = vmul.f32 %v403_v13, %v1234_v15  ;;  %v405_v1 = vpop.f32.mrb[19].mxu0  ;;  %v485_v19 = vpop.f32.mrb[19].mxu1 }
 0x196   : > { %v558_v2 = vadd.f32 %v557_v9, %v527_v16 }
 0x197   : > { %v408_v23 = vpop.f32.mrb[20].mxu0  ;;  %v488_v26 = vpop.f32.mrb[20].mxu1 }
 0x198   : > { %v528_v11 = vmul.f32 %v408_v23, %v1241_v17  ;;  %v410_v29 = vpop.f32.mrb[21].mxu0  ;;  %v490_v32 = vpop.f32.mrb[21].mxu1  ;;  %v534_v23 = vmul.f32 %v1355_v51, %v1271_v27  ;;  %v539_v27 = vmul.f32 %v1370_v35, %v1294_v34 }
 0x19a   : > { %v559_v3 = vadd.f32 %v558_v2, %v528_v11  ;;  %v535_v11 = vmul.f32 %v1357_v55, %v1274_v28  ;;  %v540_v28 = vmul.f32 %v1373_v50, %v1301_v36 }
 0x19b   : > { %v413_v38 = vpop.f32.mrb[22].mxu0  ;;  %v493_v41 = vpop.f32.mrb[22].mxu1 }
 0x19c   : > { %v529_v14 = vmul.f32 %v413_v38, %v1244_v18  ;;  %v415_v44 = vpop.f32.mrb[23].mxu0  ;;  %v495_v47 = vpop.f32.mrb[23].mxu1  ;;  %v545_v34 = vmul.f32 %v493_v41, %v1324_v43 }
 0x19d   : > { %v542_v44 = vmul.f32 %v478_v63, %v1311_v39  ;;  %v543_v47 = vmul.f32 %v483_v10, %v1314_v40 }
 0x19e   : > { %v560_v5 = vadd.f32 %v559_v3, %v529_v14  ;;  %v537_v3 = vmul.f32 %v1364_v12, %v1284_v31 }
 0x19f   : > { %v418_v52 = vpop.f32.mrb[24].mxu0  ;;  %v498_v53 = vpop.f32.mrb[24].mxu1 }
 0x1a0   : > { %v530_v15 = vmul.f32 %v418_v52, %v1251_v21  ;;  %v420_v54 = vpop.f32.mrb[25].mxu0  ;;  %v500_v56 = vpop.f32.mrb[25].mxu1  ;;  %v546_v35 = vmul.f32 %v498_v53, %v1331_v45 }
 0x1a2   : > { %v561_v7 = vadd.f32 %v560_v5, %v530_v15  ;;  %v517_v15 = vld [vmem:[%s1352_s17] sm:$0x1] }
 0x1a3   : > { %v423_v58 = vpop.f32.mrb[26].mxu0  ;;  %v503_v59 = vpop.f32.mrb[26].mxu1 }
 0x1a4   : > { %v531_v17 = vmul.f32 %v423_v58, %v1254_v22  ;;  %v425_v60 = vpop.f32.mrb[27].mxu0  ;;  %v505_v61 = vpop.f32.mrb[27].mxu1  ;;  %v547_v50 = vmul.f32 %v503_v59, %v1334_v46 }
 0x1a6   : > { %v562_v8 = vadd.f32 %v561_v7, %v531_v17 }
 0x1a7   : > { %v428_v0 = vpop.f32.mrb[28].mxu0  ;;  %v508_v4 = vpop.f32.mrb[28].mxu1 }
 0x1a8   : > { %v532_v18 = vmul.f32 %v428_v0, %v1261_v24  ;;  %v430_v6 = vpop.f32.mrb[29].mxu0  ;;  %v510_v9 = vpop.f32.mrb[29].mxu1  ;;  %v536_v24 = vmul.f32 %v1361_v62, %v1281_v30  ;;  %v541_v30 = vmul.f32 %v1376_v57, %v1304_v37  ;;  %v548_v57 = vmul.f32 %v508_v4, %v1341_v48 }
 0x1aa   : > { %v563_v13 = vadd.f32 %v562_v8, %v532_v18 }
 0x1ab   : > { %v433_v16 = vpop.f32.mrb[30].mxu0  ;;  %v513_v1 = vpop.f32.mrb[30].mxu1 }
 0x1ac   : > { %v533_v21 = vmul.f32 %v433_v16, %v1264_v25  ;;  %v435_v19 = vpop.f32.mrb[31].mxu0  ;;  %v515_v2 = vpop.f32.mrb[31].mxu1  ;;  %v538_v25 = vmul.f32 %v1367_v20, %v1291_v33  ;;  %v544_v20 = vmul.f32 %v488_v26, %v1321_v42  ;;  %v549_v40 = vmul.f32 %v513_v1, %v1344_v49 }
 0x1ae   : > { %v564_v22 = vadd.f32 %v563_v13, %v533_v21 }
 0x1b0   : > { %v565_v29 = vadd.f32 %v564_v22, %v534_v23 }
 0x1b2   : > { %v566_v32 = vadd.f32 %v565_v29, %v535_v11 }
 0x1b4   : > { %v567_v38 = vadd.f32 %v566_v32, %v536_v24 }
 0x1b6   : > { %v568_v14 = vadd.f32 %v567_v38, %v537_v3 }
 0x1b8   : > { %v569_v51 = vadd.f32 %v568_v14, %v538_v25 }
 0x1ba   : > { %v570_v55 = vadd.f32 %v569_v51, %v539_v27 }
 0x1bc   : > { %v571_v62 = vadd.f32 %v570_v55, %v540_v28 }
 0x1be   : > { %v572_v31 = vadd.f32 %v571_v62, %v541_v30 }
 0x1c0   : > { %v573_v12 = vadd.f32 %v572_v31, %v542_v44 }
 0x1c2   : > { %v574_v33 = vadd.f32 %v573_v12, %v543_v47 }
 0x1c4   : > { %v575_v5 = vadd.f32 %v574_v33, %v544_v20 }
 0x1c6   : > { %v576_v36 = vadd.f32 %v575_v5, %v545_v34 }
 0x1c8   : > { %v577_v37 = vadd.f32 %v576_v36, %v546_v35 }
 0x1ca   : > { %v578_v39 = vadd.f32 %v577_v37, %v547_v50 }
 0x1cc   : > { %v579_v42 = vadd.f32 %v578_v39, %v548_v57 }
 0x1ce   : > { %v580_v63 = vadd.f32 %v579_v42, %v549_v40 }
 0x1d0   : > { %v581_v10 = vrot.slane %v580_v63, 4 }
 0x1d2   : > { %v582_v43 = vadd.f32 %v581_v10, %v580_v63 }
 0x1d4   : > { %v583_v26 = vrot.slane %v582_v43, 2 }
 0x1d6   : > { %v584_v41 = vadd.f32 %v583_v26, %v582_v43 }
 0x1d8   : > { %v585_v52 = vrot.slane %v584_v41, 1 }
 0x1da   : > { %v586_v45 = vadd.f32 %v585_v52, %v584_v41 }
 0x1dc   : > { %v587_v46 = vadd.f32 %v586_v45, %v517_v15 }
 0x1de   : > { %588 = vst [vmem:[%s1352_s17] sm:$0x1] %v587_v46 }
 0x1df   : > { %932 = shalt.err (!%p929_p6)
}
 0x1e0   : > { %s933_s5 = scalar_lea.hbm %s1417_s6, 16  ;;  %s937_s16 = scalar_lea.hbm %s1468_s2, 64 }
 0x1e1   : > { %p934_p12 = scmp.ne.s32.totalorder %s1417_s6, %s933_s5  ;;  %p938_p10 = scmp.lt.u32.totalorder %s1417_s6, %s1468_s2 }
 0x1e2   : > { %p939_p1 = scmp.lt.u32.totalorder %s937_s16, %s933_s5  ;;  %p941_p9 = scmp.lt.u32.totalorder %s933_s5, %s1417_s6 }
 0x1e3   : > { %p935_p2 = pnand %p934_p12, %p1487_p11 }
 0x1e4   : > { %p940_p8 = por %p939_p1, %p938_p10 }
 0x1e5   : > { %p936_p7 = pneg %p935_p2 }
 0x1e6   : > { %p942_p4 = por %p941_p9, %p940_p8 }
 0x1e8   : > { %p943_p13 = pnand %p942_p4, %p936_p7 }
 0x1ea   : > { %946 = shalt.err (!%p943_p13)
}
 0x1eb   : > { %787 = dma.vmem_to_hbm [thread:$0]  (%p1487_p11), %s1419_s22, 16, %s1417_s6, %s590_s8  }
 0x1ec PF: > { %p804_p0 = scmp.ge.s32.totalorder %s1005_s14, 2  ;;  %s614_s29 = sand.u32 1, %s985_s9  }
 0x1ed   : > { %p1488_p5 = scmp.ne.s32.totalorder %s1479_s21, 0  ;;  %s615_s3 = scalar_lea.sflag [#allocation4], %s614_s29 }
 0x1ef   : > { %p798_p3 = pnand %p804_p0, %p1488_p5 }
 0x1f1   : > { %980 = dma.done.wait (!%p798_p3), %s615_s3, 16  }
 0x1f2   : > { %982 = vsyncadd (!%p798_p3), %s615_s3, 4294967280  ;;  %s19_s14 = sadd.s32 1, %s1005_s14   ;;  %s1489_s9 = smov %s989_s10 }
 0x1f3   : > { %p16_p6 = scmp.ge.s32.totalorder %s19_s14, 6   ;;  %s1490_s10 = smov %s993_s11 }
 0x1f4   : > { %s1491_s11 = smov %s1142_s7  ;;  %s1492_s12 = smov %s1001_s13 }
 0x1f5   : > { %s1493_s13 = smov %s1495_s27  ;;  %18 = sbr.rel (!%p16_p6) target bundleno = 7 (0x7), region = 81 }
 0x1fc   :  { %619 = vsyncpa [#allocation3], 1 }
 0x1fd   :  { %621 = vsyncpa [#allocation3 + $0x1], 1 }
 0x1fe   :  { %622 = vsyncpa [#allocation6], 1 }
 0x1ff   :  { %623 = vsyncpa [#allocation4], 1 }
 0x200   :  { %625 = vsyncpa [#allocation4 + $0x1], 1 }

</bundles_post_ra>
